<compile_context>
chip_gen: v6e
topology: v6e:2x2x1
jax: 0.10.0
libtpu: 0.0.40
codegen_flags: <defaults>
</compile_context>

<pallas_src>
import jax
import jax.numpy as jnp
from jax.experimental import pallas as pl
from jax.experimental.pallas import tpu as pltpu


def _round_up(x, m):
    return ((x + m - 1) // m) * m


# ---------------- tiny / single-block path (no pad, no slice) ----------------
def _mm_bias_small_kernel(x1_ref, x2_ref, inp_ref, o_ref):
    acc = jnp.dot(x1_ref[...], x2_ref[...], preferred_element_type=jnp.float32)
    o_ref[...] = (acc + inp_ref[...].astype(jnp.float32)).astype(o_ref.dtype)


# -------- tiled path, f32 output: accumulate directly in the output block ----
def _mm_bias_kernel_f32(x1_ref, x2_ref, inp_ref, o_ref):
    k = pl.program_id(2)

    @pl.when(k == 0)
    def _():
        # Fold the bias in on the first K step (VPU work hidden under MXU);
        # no scratch accumulator and no epilogue copy needed.
        o_ref[...] = inp_ref[...]

    o_ref[...] += jnp.dot(
        x1_ref[...], x2_ref[...], preferred_element_type=jnp.float32
    )


# -------- tiled path, non-f32 output: f32 scratch accumulator ----------------
def _mm_bias_kernel_acc(x1_ref, x2_ref, inp_ref, o_ref, acc_ref):
    k = pl.program_id(2)

    @pl.when(k == 0)
    def _():
        acc_ref[...] = inp_ref[...].astype(jnp.float32)

    acc_ref[...] += jnp.dot(
        x1_ref[...], x2_ref[...], preferred_element_type=jnp.float32
    )

    @pl.when(k == pl.num_programs(2) - 1)
    def _():
        o_ref[...] = acc_ref[...].astype(o_ref.dtype)


def model_forward(x1, x2, inp, *, tm=512, tn=512, tk=512,
                  small_path_bytes=4 << 20):
    """Computes x1 @ x2 + inp with Pallas TPU kernels."""
    M, K = x1.shape
    K2, N = x2.shape
    assert K == K2 and inp.shape == (M, N)
    out_dtype = x1.dtype
    itemsize = jnp.dtype(out_dtype).itemsize

    # ---- tiny problems: one full-shape block (exempt from the (8,128) rule),
    #      skips all padding / slicing / multi-step grid overhead. ----
    total_bytes = (M * K + K * N + 2 * M * N) * itemsize
    if total_bytes <= small_path_bytes:
        return pl.pallas_call(
            _mm_bias_small_kernel,
            out_shape=jax.ShapeDtypeStruct((M, N), out_dtype),
            grid=(1,),
            in_specs=[
                pl.BlockSpec((M, K), lambda i: (0, 0)),
                pl.BlockSpec((K, N), lambda i: (0, 0)),
                pl.BlockSpec((M, N), lambda i: (0, 0)),
            ],
            out_specs=pl.BlockSpec((M, N), lambda i: (0, 0)),
        )(x1, x2, inp)

    # ---- general tiled path ----
    # Shrink tiles to the (8,128)-aligned problem size so mid-size problems
    # are not over-padded, while large problems keep 512-class MXU tiles.
    tm = min(tm, _round_up(M, 8))
    tn = min(tn, _round_up(N, 128))
    tk = min(tk, _round_up(K, 128))

    Mp, Kp, Np = _round_up(M, tm), _round_up(K, tk), _round_up(N, tn)

    # Pads are no-ops when the shapes already divide the chosen tiles.
    x1p = jnp.pad(x1, ((0, Mp - M), (0, Kp - K))) if (Mp, Kp) != (M, K) else x1
    x2p = jnp.pad(x2, ((0, Kp - K), (0, Np - N))) if (Kp, Np) != (K, N) else x2
    inpp = jnp.pad(inp, ((0, Mp - M), (0, Np - N))) if (Mp, Np) != (M, N) else inp

    grid = (Mp // tm, Np // tn, Kp // tk)

    cost = pl.CostEstimate(
        flops=2 * Mp * Np * Kp,
        transcendentals=0,
        bytes_accessed=(Mp * Kp + Kp * Np + 2 * Mp * Np) * itemsize,
    )

    is_f32 = out_dtype == jnp.float32
    kernel = _mm_bias_kernel_f32 if is_f32 else _mm_bias_kernel_acc
    scratch = [] if is_f32 else [pltpu.VMEM((tm, tn), jnp.float32)]

    out_p = pl.pallas_call(
        kernel,
        out_shape=jax.ShapeDtypeStruct((Mp, Np), out_dtype),
        grid=grid,
        in_specs=[
            pl.BlockSpec((tm, tk), lambda i, j, k: (i, k)),
            pl.BlockSpec((tk, tn), lambda i, j, k: (k, j)),
            pl.BlockSpec((tm, tn), lambda i, j, k: (i, j)),
        ],
        out_specs=pl.BlockSpec((tm, tn), lambda i, j, k: (i, j)),
        scratch_shapes=scratch,
        compiler_params=pltpu.CompilerParams(
            dimension_semantics=("parallel", "parallel", "arbitrary"),
            # 512-class tiles need ~8-12 MiB double-buffered; 48 MiB leaves
            # headroom on every generation incl. v7x (64 MiB physical VMEM).
            vmem_limit_bytes=48 * 1024 * 1024,
        ),
        cost_estimate=cost,
    )(x1p, x2p, inpp)

    return out_p[:M, :N] if (Mp, Np) != (M, N) else out_p


if __name__ == "__main__":
    key = jax.random.PRNGKey(0)
    k1, k2, k3, k4, k5, k6 = jax.random.split(key, 6)

    # ---- Spec shapes: 3x3 mm + 3x3 learned bias (single-block fast path) ----
    x1 = jax.random.normal(k1, (3, 3), dtype=jnp.float32)
    x2 = jax.random.normal(k2, (3, 3), dtype=jnp.float32)
    inp = jax.random.normal(k3, (3, 3), dtype=jnp.float32)  # self.inp parameter

    out = model_forward(x1, x2, inp)
    jax.block_until_ready(out)
    ref = jnp.dot(x1, x2) + inp
    assert jnp.allclose(out, ref, atol=1e-5, rtol=1e-5), (out, ref)

    # ---- Non-aligned mid-size shapes, forced through the tiled/padded path
    #      (small_path_bytes=0) to exercise multi-block grid + remainder pad. ----
    a = jax.random.normal(k4, (300, 200), dtype=jnp.float32)
    b = jax.random.normal(k5, (200, 260), dtype=jnp.float32)
    c = jax.random.normal(k6, (300, 260), dtype=jnp.float32)
    out2 = model_forward(a, b, c, tm=128, tn=128, tk=128, small_path_bytes=0)
    jax.block_until_ready(out2)
    ref2 = jnp.dot(a, b) + c
    assert jnp.allclose(out2, ref2, atol=1e-4, rtol=1e-4)

    # ---- Aligned shapes with the default 512-class tiles: no padding,
    #      direct-into-output f32 accumulation, multi-block grid. ----
    a3 = jax.random.normal(k4, (512, 1024), dtype=jnp.float32)
    b3 = jax.random.normal(k5, (1024, 1024), dtype=jnp.float32)
    c3 = jax.random.normal(k6, (512, 1024), dtype=jnp.float32)
    out3 = model_forward(a3, b3, c3, small_path_bytes=0)
    jax.block_until_ready(out3)
    ref3 = jnp.dot(a3, b3) + c3
    assert jnp.allclose(out3, ref3, atol=5e-3, rtol=1e-3)

    print("KERNEL_OK")
</pallas_src>

<mosaic_0001>
module attributes {stable_mosaic.version = 11 : i64} {
  func.func @_mm_bias_small_kernel(%arg0: i32, %arg1: memref<3x3xf32, #tpu.memory_space<vmem>>, %arg2: memref<3x3xf32, #tpu.memory_space<vmem>>, %arg3: memref<3x3xf32, #tpu.memory_space<vmem>>, %arg4: memref<3x3xf32, #tpu.memory_space<vmem>>) attributes {dimension_semantics = [#tpu.dimension_semantics<arbitrary>], iteration_bounds = array<i64: 1>, scalar_prefetch = 0 : i64, scratch_operands = 0 : i64, tpu.core_type = #tpu.core_type<tc>, window_params = [{pipeline_mode = #tpu.pipeline_mode<synchronous>, transform_indices = @transform_0, window_bounds = array<i64: 3, 3>}, {pipeline_mode = #tpu.pipeline_mode<synchronous>, transform_indices = @transform_1, window_bounds = array<i64: 3, 3>}, {pipeline_mode = #tpu.pipeline_mode<synchronous>, transform_indices = @transform_2, window_bounds = array<i64: 3, 3>}, {pipeline_mode = #tpu.pipeline_mode<synchronous>, transform_indices = @transform_3, window_bounds = array<i64: 3, 3>}]} {
    %c0 = arith.constant 0 : index
    %c0_0 = arith.constant 0 : index
    %0 = vector.load %arg1[%c0, %c0_0] : memref<3x3xf32, #tpu.memory_space<vmem>>, vector<3x3xf32>
    %c0_1 = arith.constant 0 : index
    %c0_2 = arith.constant 0 : index
    %1 = vector.load %arg2[%c0_1, %c0_2] : memref<3x3xf32, #tpu.memory_space<vmem>>, vector<3x3xf32>
    %cst = arith.constant dense<0.000000e+00> : vector<3x3xf32>
    %2 = tpu.matmul %0, %1, %cst {dimension_numbers = #tpu.dot_dimension_numbers<[1], [0], [0], [1], [0, 0, 1, 1], [], []>} : vector<3x3xf32>, vector<3x3xf32>, vector<3x3xf32> -> vector<3x3xf32>
    %c0_3 = arith.constant 0 : index
    %c0_4 = arith.constant 0 : index
    %3 = vector.load %arg3[%c0_3, %c0_4] : memref<3x3xf32, #tpu.memory_space<vmem>>, vector<3x3xf32>
    %4 = arith.addf %2, %3 : vector<3x3xf32>
    %c0_5 = arith.constant 0 : index
    %c0_6 = arith.constant 0 : index
    %5 = vector.load %arg4[%c0_5, %c0_6] : memref<3x3xf32, #tpu.memory_space<vmem>>, vector<3x3xf32>
    tpu.vector_store %arg4[%c0_5, %c0_6], %4 {strides = array<i32>} : memref<3x3xf32, #tpu.memory_space<vmem>>, vector<3x3xf32>,
    return
  }
  func.func @transform_0(%arg0: i32) -> (i32, i32) {
    %c0_i32 = arith.constant 0 : i32
    %c0_i32_0 = arith.constant 0 : i32
    %c0_i32_1 = arith.constant 0 : i32
    return %c0_i32, %c0_i32_0 : i32, i32
  }
  func.func @transform_1(%arg0: i32) -> (i32, i32) {
    %c0_i32 = arith.constant 0 : i32
    %c0_i32_0 = arith.constant 0 : i32
    %c0_i32_1 = arith.constant 0 : i32
    return %c0_i32, %c0_i32_0 : i32, i32
  }
  func.func @transform_2(%arg0: i32) -> (i32, i32) {
    %c0_i32 = arith.constant 0 : i32
    %c0_i32_0 = arith.constant 0 : i32
    %c0_i32_1 = arith.constant 0 : i32
    return %c0_i32, %c0_i32_0 : i32, i32
  }
  func.func @transform_3(%arg0: i32) -> (i32, i32) {
    %c0_i32 = arith.constant 0 : i32
    %c0_i32_0 = arith.constant 0 : i32
    %c0_i32_1 = arith.constant 0 : i32
    return %c0_i32, %c0_i32_0 : i32, i32
  }
}

</mosaic_0001>

<bundles_post_ra>
// kernel: tpu_custom_call.1
= control target key start
LH: loop header
LB: loop body
LE: loop exit
PB: predicated region body
PF: predicated region fallthrough
CT: control target
= control target key end

     0   :  { %8 = vsyncpa [#allocation3], 0  ;;  %s288_s0 = inlined_call_operand.hbm [shape: f32[3,3], index: 0, kind: input, shape index: {}]   ;;  %s289_s1 = inlined_call_operand.hbm [shape: f32[3,3], index: 1, kind: input, shape index: {}]   ;;  %s290_s2 = inlined_call_operand.hbm [shape: f32[3,3], index: 2, kind: input, shape index: {}]   ;;  %s291_s3 = inlined_call_operand.hbm [shape: f32[3,3], index: 3, kind: output, shape index: {}]  }
   0x1   :  { %9 = vsyncpa [#allocation6], 0 }
   0x2   :  { %10 = vsyncpa [#allocation4], 0  ;;  %s250_s12 = smov [#allocation5]   ;;  %s251_s14 = smov [#allocation2]  }
   0x3   :  { %s27_s13 = sshll.u32 %s250_s12, 4  ;;  %s17_s15 = sshll.u32 %s251_s14, 4  ;;  %s28_s13 = int_to_ptr.vmem [resolvable:$true] %s27_s13  ;;  %s18_s15 = int_to_ptr.vmem [resolvable:$true] %s17_s15 }
   0x4   :  { %s172_s16 = scalar_lea.vmem %s28_s13, 64  ;;  %p177_p1 = scmp.lt.s32.totalorder %s28_s13, %s28_s13 }
   0x5   :  { %p173_p0 = scmp.ne.s32.totalorder %s28_s13, %s172_s16  ;;  %p178_p2 = scmp.lt.s32.totalorder %s172_s16, %s172_s16 }
   0x7   :  { %p179_p3 = por %p178_p2, %p177_p1 }
   0x9   :  { %p180_p4 = pnand %p179_p3, %p173_p0 }
   0xb   :  { %183 = shalt.err (!%p180_p4)
}
   0xc   :  { %30 = dma.hbm_to_vmem [thread:$0]  %s289_s1, 64, %s28_s13, [#allocation6]  }
   0xd   :  { %s192_s19 = scalar_lea.vmem %s18_s15, 64  ;;  %p197_p6 = scmp.lt.s32.totalorder %s18_s15, %s18_s15 }
   0xe   :  { %p193_p5 = scmp.ne.s32.totalorder %s18_s15, %s192_s19  ;;  %p198_p7 = scmp.lt.s32.totalorder %s192_s19, %s192_s19 }
  0x10   :  { %p199_p8 = por %p198_p7, %p197_p6 }
  0x12   :  { %p200_p9 = pnand %p199_p8, %p193_p5 }
  0x14   :  { %203 = shalt.err (!%p200_p9)
}
  0x15   :  { %20 = dma.hbm_to_vmem [thread:$0]  %s288_s0, 64, %s18_s15, [#allocation3]  }
  0x16   :  { %s252_s22 = smov [#allocation7]  }
  0x17   :  { %s37_s23 = sshll.u32 %s252_s22, 4  ;;  %s38_s23 = int_to_ptr.vmem [resolvable:$true] %s37_s23 }
  0x18   :  { %s212_s24 = scalar_lea.vmem %s38_s23, 64  ;;  %p217_p11 = scmp.lt.s32.totalorder %s38_s23, %s38_s23 }
  0x19   :  { %p213_p10 = scmp.ne.s32.totalorder %s38_s23, %s212_s24  ;;  %p218_p12 = scmp.lt.s32.totalorder %s212_s24, %s212_s24 }
  0x1b   :  { %p219_p13 = por %p218_p12, %p217_p11 }
  0x1d   :  { %p220_p0 = pnand %p219_p13, %p213_p10 }
  0x1f   :  { %223 = shalt.err (!%p220_p0)
}
  0x20   :  { %40 = dma.hbm_to_vmem [thread:$0]  %s290_s2, 64, %s38_s23, [#allocation6]  }
  0x21   :  { %244 = dma.done.wait [#allocation3], 64  }
  0x22   :  { %245 = vsyncadd [#allocation3], 4294967232 }
  0x23   :  { %246 = dma.done.wait [#allocation6], 128  }
  0x24   :  { %247 = vsyncadd [#allocation6], 4294967168  ;;  %v253_v0 = vmov 0.0   ;;  %vm254_vm0 = vmmov 0   ;;  %vm57_vm1 = vcmask 1042432   ;;  %vm53_vm2 = vcmask 23552  }
  0x25   :  { %153 = vmatprep.subr.mxu0 %v253_v0  ;;  %155 = vmatprep.mubr.msk.f32.mxu0 %vm254_vm0, %v253_v0  ;;  %v51_v1 = vld [vmem:[#allocation5] sm:$0x7]  ;;  %v50_v2 = vld [vmem:[#allocation2] sm:$0x7]  ;;  %v52_v3 = vld [vmem:[#allocation7] sm:$0x7] }
  0x26   :  { %154 = vmatpush3.msk.msra.mxu0 %vm57_vm1, %v51_v1  ;;  %s255_s0 = smov [#allocation8]   ;;  %vm131_vm3 = vcmask 18432  }
  0x27   :  { %156 = vmatmul.mubr.msk.f32.vlgmr.msra.gmra.mxu0 %vm53_vm2, %v50_v2  ;;  %s139_s26 = sshll.u32 %s255_s0, 4  ;;  %s140_s26 = int_to_ptr.vmem [resolvable:$true] %s139_s26 }
  0x28   :  { %s224_s2 = scalar_lea.vmem %s140_s26, 64  ;;  %p229_p2 = scmp.lt.s32.totalorder %s140_s26, %s140_s26 }
  0x29   :  { %p225_p1 = scmp.ne.s32.totalorder %s140_s26, %s224_s2  ;;  %p230_p3 = scmp.lt.s32.totalorder %s224_s2, %s224_s2 }
  0x2b   :  { %p231_p4 = por %p230_p3, %p229_p2 }
  0x2d   :  { %p232_p5 = pnand %p231_p4, %p225_p1 }
  0xe7   :  { %v127_v4 = vpop.f32.mrf.mxu0 }
  0xe8   :  { %v128_v5 = vadd.f32 %v127_v4, %v52_v3 }
  0xe9   :  { %v157_v6 = vpop.f32.mrf.mxu0 }
  0xea   :  { %132 = vst.msk [vmem:[#allocation8] sm:$0x7] %vm131_vm3, %v128_v5 }
  0xeb   :  { %235 = shalt.err (!%p232_p5)
}
  0xec   :  { %142 = dma.vmem_to_hbm [thread:$0]  %s140_s26, 64, %s291_s3, [#allocation4]  }
  0xed   :  { %248 = dma.done.wait [#allocation4], 64  }
  0xee   :  { %249 = vsyncadd [#allocation4], 4294967232 }
  0xef   :  { %146 = vsyncpa [#allocation3], 1 }
  0xf0   :  { %147 = vsyncpa [#allocation6], 1 }
  0xf1   :  { %148 = vsyncpa [#allocation4], 1 }

</bundles_post_ra>
